<compile_context>
chip_gen: v5e
topology: v5e:2x2
jax: 0.10.0
libtpu: 0.0.40
codegen_flags: <defaults>
</compile_context>

<pallas_src>
import jax
import jax.numpy as jnp
from jax.experimental import pallas as pl
from jax.experimental.pallas import tpu as pltpu


def _linear_rowsum_kernel(x_ref, w_ref, o_ref):
    # x_ref: (TB, N) VMEM tile, w_ref: (1, N) VMEM tile, o_ref: (TB, 1).
    # VPU multiply (broadcast of the single weight row) + cross-lane reduce.
    # Avoids the MXU entirely and the explicit weight transpose.
    x = x_ref[...]                       # (TB, N)
    w = w_ref[...]                       # (1, N) -> broadcasts over rows
    acc = jnp.sum(x * w, axis=-1, keepdims=True)   # (TB, 1), f32
    o_ref[...] = acc.astype(o_ref.dtype)
    # TODO(synk): if this kernel is ever scaled to very large B, emit the
    # result lane-dense (B on the last axis) to avoid masked vst.msk stores;
    # negligible at the sizes exercised here.


def linear_no_bias(x, w, *, tb=512):
    """x: (B, N) f32, w: (1, N) f32 -> (B, 1) f32 (== x @ w.T)."""
    B, N = x.shape
    assert w.shape == (1, N)

    if B <= tb:
        # Small case: single invocation, whole arrays resident in VMEM,
        # no grid / no per-step overhead.
        return pl.pallas_call(
            _linear_rowsum_kernel,
            out_shape=jax.ShapeDtypeStruct((B, 1), x.dtype),
            in_specs=[
                pl.BlockSpec(memory_space=pltpu.MemorySpace.VMEM),
                pl.BlockSpec(memory_space=pltpu.MemorySpace.VMEM),
            ],
            out_specs=pl.BlockSpec(memory_space=pltpu.MemorySpace.VMEM),
        )(x, w)

    # Large-B case: tile rows. The row axis is "parallel" (shardable across
    # TensorCores on v7x; harmless single-core loop on v5e/v6e). The weight
    # block index is constant so the (1, N) row stays VMEM-resident and is
    # DMA'd once. tb=512 rows keeps 2 inputs x 2 buffers x tb*N*4B small
    # relative to VMEM even on v7x (64 MiB).
    grid = (pl.cdiv(B, tb),)
    return pl.pallas_call(
        _linear_rowsum_kernel,
        out_shape=jax.ShapeDtypeStruct((B, 1), x.dtype),
        grid=grid,
        in_specs=[
            pl.BlockSpec((tb, N), lambda i: (i, 0)),
            pl.BlockSpec((1, N), lambda i: (0, 0)),
        ],
        out_specs=pl.BlockSpec((tb, 1), lambda i: (i, 0)),
        compiler_params=pltpu.CompilerParams(
            dimension_semantics=("parallel",)
        ),
    )(x, w)


def make_param(input_num):
    # Deterministic init matching TestModule.reset_parameters():
    #   param = zeros(1, input_num); param[0,0]=0.25111; param[0,1]=0.5
    p = jnp.zeros((1, input_num), dtype=jnp.float32)
    p = p.at[0, 0].set(0.25111)
    p = p.at[0, 1].set(0.5)
    return p


if __name__ == "__main__":
    # --- small case (matches the test module's intended usage) ---
    input_num = 32
    batch = 8

    key = jax.random.PRNGKey(0)
    x = jax.random.normal(key, (batch, input_num), dtype=jnp.float32)
    param = make_param(input_num)

    out = linear_no_bias(x, param)
    out = jax.block_until_ready(out)

    ref = x @ param.T
    assert out.shape == (batch, 1)
    assert jnp.allclose(out, ref, atol=1e-5, rtol=1e-5)

    # --- larger case to exercise the tiled / parallel path ---
    B2, N2 = 1024, 256
    k1, k2 = jax.random.split(key)
    x2 = jax.random.normal(k1, (B2, N2), dtype=jnp.float32)
    w2 = jax.random.normal(k2, (1, N2), dtype=jnp.float32)

    out2 = jax.block_until_ready(linear_no_bias(x2, w2))
    ref2 = x2 @ w2.T
    assert out2.shape == (B2, 1)
    assert jnp.allclose(out2, ref2, atol=1e-4, rtol=1e-4)

    print("KERNEL_OK")
</pallas_src>

<mosaic_0001>
module attributes {stable_mosaic.version = 11 : i64} {
  func.func @_linear_rowsum_kernel(%arg0: memref<8x32xf32, #tpu.memory_space<vmem>>, %arg1: memref<1x32xf32, #tpu.memory_space<vmem>>, %arg2: memref<8x1xf32, #tpu.memory_space<vmem>>) attributes {dimension_semantics = [], scalar_prefetch = 0 : i64, scratch_operands = 0 : i64, tpu.core_type = #tpu.core_type<tc>} {
    %c0 = arith.constant 0 : index
    %c0_0 = arith.constant 0 : index
    %0 = vector.load %arg0[%c0, %c0_0] : memref<8x32xf32, #tpu.memory_space<vmem>>, vector<8x32xf32>
    %c0_1 = arith.constant 0 : index
    %c0_2 = arith.constant 0 : index
    %1 = vector.load %arg1[%c0_1, %c0_2] : memref<1x32xf32, #tpu.memory_space<vmem>>, vector<1x32xf32>
    %2 = vector.broadcast %1 : vector<1x32xf32> to vector<8x32xf32>
    %3 = arith.mulf %0, %2 : vector<8x32xf32>
    %cst = arith.constant dense<0.000000e+00> : vector<8xf32>
    %4 = vector.multi_reduction <add>, %3, %cst [1] : vector<8x32xf32> to vector<8xf32>
    %5 = vector.shape_cast %4 : vector<8xf32> to vector<8x1xf32>
    %c0_3 = arith.constant 0 : index
    %c0_4 = arith.constant 0 : index
    %6 = vector.load %arg2[%c0_3, %c0_4] : memref<8x1xf32, #tpu.memory_space<vmem>>, vector<8x1xf32>
    tpu.vector_store %arg2[%c0_3, %c0_4], %5 {strides = array<i32>} : memref<8x1xf32, #tpu.memory_space<vmem>>, vector<8x1xf32>,
    return
  }
}

</mosaic_0001>

<bundles_post_ra>
// kernel: tpu_custom_call.1
= control target key start
LH: loop header
LB: loop body
LE: loop exit
PB: predicated region body
PF: predicated region fallthrough
CT: control target
= control target key end

     0   :  { %7 = vsyncpa [#allocation3], 0  ;;  %s138_s0 = inlined_call_operand.hbm [shape: f32[8,32], index: 0, kind: input, shape index: {}]   ;;  %s139_s1 = inlined_call_operand.hbm [shape: f32[1,32], index: 1, kind: input, shape index: {}]   ;;  %s140_s2 = inlined_call_operand.vmem [shape: f32[8,1], index: 2, kind: output, shape index: {}]  }
   0x1   :  { %s14_s11 = sshll.u32 %s138_s0, 4  ;;  %s15_s11 = int_to_ptr.hbm [resolvable:$true] %s14_s11 }
   0x2   :  { %8 = vsyncpa [#allocation5], 0  ;;  %s112_s12 = smov [#allocation2]   ;;  %s25_s16 = sshll.u32 %s139_s1, 4  ;;  %s26_s16 = int_to_ptr.hbm [resolvable:$true] %s25_s16 }
   0x3   :  { %s16_s13 = sshll.u32 %s112_s12, 4  ;;  %s113_s17 = smov [#allocation4]   ;;  %s17_s13 = int_to_ptr.vmem [resolvable:$true] %s16_s13 }
   0x4   :  { %19 = dma.hbm_to_vmem [thread:$0]  %s15_s11, 128, %s17_s13, [#allocation3]  }
   0x5   :  { %s27_s18 = sshll.u32 %s113_s17, 4  ;;  %s28_s18 = int_to_ptr.vmem [resolvable:$true] %s27_s18 }
   0x6   :  { %30 = dma.hbm_to_vmem [thread:$0]  %s26_s16, 16, %s28_s18, [#allocation5]  }
   0x7   :  { %108 = dma.done.wait [#allocation3], 128  }
   0x8   :  { %109 = vsyncadd [#allocation3], 4294967168 }
   0x9   :  { %110 = dma.done.wait [#allocation5], 16  }
   0xa   :  { %111 = vsyncadd [#allocation5], 4294967280  ;;  %v39_v0 = vld [vmem:[#allocation2] sm:$0xff]  ;;  %v59_v1 = vld [vmem:[#allocation4] ss:$0 sm:$0xff]  ;;  %vm45_vm0 = vcmask 261120  }
   0xb   :  { %v44_v2 = vmul.f32 %v59_v1, %v39_v0  ;;  %vm49_vm1 = vcmask 7168  }
   0xd   :  { %v46_v3 = vsel %vm45_vm0, %v44_v2, 0.0 }
   0xe   :  { %47 = vadd.xlane.f32.xlu0 %v46_v3 }
  0x81   :  { %v48_v4 = vpop.xlane.xlu0 %47 }
  0x82   :  { %50 = vst.msk [vmem:[%s140_s2] sm:$0xff] %vm49_vm1, %v48_v4 }
  0x83   :  { %55 = vsyncpa [#allocation3], 1 }
  0x84   :  { %56 = vsyncpa [#allocation5], 1 }

</bundles_post_ra>
